<compile_context>
chip_gen: v7x
topology: tpu7x:2x2x1
jax: 0.10.0
libtpu: 0.0.40
codegen_flags: <defaults>
</compile_context>

<pallas_src>
import jax
import jax.numpy as jnp
from jax.experimental import pallas as pl
from jax.experimental.pallas import tpu as pltpu


def _round_up(a: int, b: int) -> int:
    return (a + b - 1) // b * b


def _nconv_kernel(a_ref, x_ref, o_ref):
    # a_ref: (W, V) grid-invariant; x_ref: (V, TN) lane-dense slab; o_ref: (W, TN)
    o_ref[...] = jnp.dot(
        a_ref[...], x_ref[...], preferred_element_type=jnp.float32
    ).astype(o_ref.dtype)


def nconv(x, A, *, max_lane_tile=4096, vmem_budget_bytes=16 * 1024 * 1024):
    """x: (N, C, V, L), A: (W, V) -> (N, C, W, L); out = einsum('ncvl,wv->ncwl')."""
    N, C, V, L = x.shape
    W, V2 = A.shape
    assert V == V2, "contraction dim mismatch"

    M = N * C * L
    itemsize = jnp.dtype(x.dtype).itemsize

    # Fold (N, C, L) onto the lane axis -> one lane-dense (W,V) @ (V,M) matmul.
    x2 = jnp.transpose(x, (2, 0, 1, 3)).reshape(V, M)

    # Lane-tile selection: the largest multiple of 128 such that the
    # double-buffered input/output blocks plus the (possibly double-buffered)
    # resident A tile stay well under the scoped-VMEM default.
    a_bytes = 2 * W * V * itemsize            # resident A (allow double buffer)
    per_lane = 2 * (V + W) * itemsize         # double-buffered x/out per lane
    cap = max(128, (vmem_budget_bytes - a_bytes) // per_lane)
    cap = min(max_lane_tile, cap // 128 * 128)

    if M <= 128:
        tn = M                                # full-extent block (tiny problems)
    elif M <= cap:
        tn = _round_up(M, 128)                # single grid step, <=127 pad lanes
    else:
        tn = cap                              # long grid, full-width tiles
    Mp = _round_up(M, tn)
    if Mp != M:
        # Zero-pad the lane axis so every block is full-width (unmasked stores).
        x2 = jnp.pad(x2, ((0, 0), (0, Mp - M)))

    grid = (Mp // tn,)

    flops = 2 * N * C * W * V * L
    bytes_accessed = itemsize * (x.size + A.size + N * C * W * L)

    out2 = pl.pallas_call(
        _nconv_kernel,
        out_shape=jax.ShapeDtypeStruct((W, Mp), x.dtype),
        grid_spec=pltpu.PrefetchScalarGridSpec(
            num_scalar_prefetch=0,
            grid=grid,
            in_specs=[
                # A is grid-invariant: same full (W, V) block every step (DMA'd once).
                pl.BlockSpec((W, V), lambda j: (0, 0)),
                # One lane-dense (V, tn) slab of the folded activations per step.
                pl.BlockSpec((V, tn), lambda j: (0, j)),
            ],
            out_specs=pl.BlockSpec((W, tn), lambda j: (0, j)),
        ),
        compiler_params=pltpu.CompilerParams(
            # Lane-tile axis is embarrassingly parallel -> shards across the
            # two TensorCores on v7x; sequential loop elsewhere.
            dimension_semantics=("parallel",),
        ),
        cost_estimate=pl.CostEstimate(
            flops=flops, transcendentals=0, bytes_accessed=bytes_accessed
        ),
    )(A, x2)

    # Unfold: (W, M) -> (W, N, C, L) -> (N, C, W, L).
    out = out2[:, :M].reshape(W, N, C, L)
    return jnp.transpose(out, (1, 2, 0, 3))


if __name__ == "__main__":
    key = jax.random.PRNGKey(0)
    kx, ka, kx2, ka2 = jax.random.split(key, 4)

    # Small shapes consistent with the module: batch=2, channels=4, nodes=16, seq=8.
    N, C, V, L = 2, 4, 16, 8
    W = V  # adjacency-like matrix (W == V in typical graph-wavenet usage)

    x = jax.random.normal(kx, (N, C, V, L), dtype=jnp.float32)
    A = jax.random.normal(ka, (W, V), dtype=jnp.float32)

    out = jax.block_until_ready(nconv(x, A))
    ref = jnp.einsum("ncvl,wv->ncwl", x, A)
    assert out.shape == (N, C, W, L)
    assert jnp.allclose(out, ref, atol=1e-5, rtol=1e-5)

    # Second (still small) case exercising the lane-padding / single-big-tile path.
    N2, C2, V2_, L2 = 2, 8, 16, 100  # M = 1600 -> padded to 1664, grid=(1,)
    W2 = V2_
    x_b = jax.random.normal(kx2, (N2, C2, V2_, L2), dtype=jnp.float32)
    A_b = jax.random.normal(ka2, (W2, V2_), dtype=jnp.float32)

    out_b = jax.block_until_ready(nconv(x_b, A_b))
    ref_b = jnp.einsum("ncvl,wv->ncwl", x_b, A_b)
    assert out_b.shape == (N2, C2, W2, L2)
    assert jnp.allclose(out_b, ref_b, atol=1e-4, rtol=1e-4)

    print("KERNEL_OK")
</pallas_src>

<mosaic_0001>
module attributes {stable_mosaic.version = 11 : i64} {
  func.func @_nconv_kernel(%arg0: i32, %arg1: memref<16x16xf32, #tpu.memory_space<vmem>>, %arg2: memref<16x64xf32, #tpu.memory_space<vmem>>, %arg3: memref<16x64xf32, #tpu.memory_space<vmem>>) attributes {dimension_semantics = [#tpu.dimension_semantics<parallel>], iteration_bounds = array<i64: 1>, scalar_prefetch = 0 : i64, scratch_operands = 0 : i64, tpu.core_type = #tpu.core_type<tc>, window_params = [{pipeline_mode = #tpu.pipeline_mode<synchronous>, transform_indices = @transform_0, window_bounds = array<i64: 16, 16>}, {transform_indices = @transform_1, window_bounds = array<i64: 16, 64>}, {transform_indices = @transform_2, window_bounds = array<i64: 16, 64>}]} {
    %c0 = arith.constant 0 : index
    %c0_0 = arith.constant 0 : index
    %0 = vector.load %arg1[%c0, %c0_0] : memref<16x16xf32, #tpu.memory_space<vmem>>, vector<16x16xf32>
    %c0_1 = arith.constant 0 : index
    %c0_2 = arith.constant 0 : index
    %1 = vector.load %arg2[%c0_1, %c0_2] : memref<16x64xf32, #tpu.memory_space<vmem>>, vector<16x64xf32>
    %cst = arith.constant dense<0.000000e+00> : vector<16x64xf32>
    %2 = tpu.matmul %0, %1, %cst {dimension_numbers = #tpu.dot_dimension_numbers<[1], [0], [0], [1], [0, 0, 1, 1], [], []>} : vector<16x16xf32>, vector<16x64xf32>, vector<16x64xf32> -> vector<16x64xf32>
    %c0_3 = arith.constant 0 : index
    %c0_4 = arith.constant 0 : index
    %3 = vector.load %arg3[%c0_3, %c0_4] : memref<16x64xf32, #tpu.memory_space<vmem>>, vector<16x64xf32>
    tpu.vector_store %arg3[%c0_3, %c0_4], %2 {strides = array<i32>} : memref<16x64xf32, #tpu.memory_space<vmem>>, vector<16x64xf32>,
    return
  }
  func.func @transform_0(%arg0: i32) -> (i32, i32) {
    %c0_i32 = arith.constant 0 : i32
    %c0_i32_0 = arith.constant 0 : i32
    %c0_i32_1 = arith.constant 0 : i32
    return %c0_i32, %c0_i32_0 : i32, i32
  }
  func.func @transform_1(%arg0: i32) -> (i32, i32) {
    %c0_i32 = arith.constant 0 : i32
    %c0_i32_0 = arith.constant 0 : i32
    return %c0_i32, %arg0 : i32, i32
  }
  func.func @transform_2(%arg0: i32) -> (i32, i32) {
    %c0_i32 = arith.constant 0 : i32
    %c0_i32_0 = arith.constant 0 : i32
    return %c0_i32, %arg0 : i32, i32
  }
}

</mosaic_0001>

<bundles_post_ra>
// kernel: tpu_custom_call.1
= control target key start
LH: loop header
LB: loop body
LE: loop exit
PB: predicated region body
PF: predicated region fallthrough
CT: control target
= control target key end

     0   :  { %7 = vsyncpa [#allocation3], 0  ;;  %s306_s0 = inlined_call_operand.hbm [shape: f32[16,16], index: 0, kind: input, shape index: {}]   ;;  %s307_s1 = inlined_call_operand.hbm [shape: f32[16,64], index: 1, kind: input, shape index: {}]   ;;  %s308_s2 = inlined_call_operand.hbm [shape: f32[16,64], index: 2, kind: output, shape index: {}]  }
   0x1   :  { %8 = vsyncpa [#allocation6], 0 }
   0x2   :  { %9 = vsyncpa [#allocation4], 0  ;;  %s241_s9 = smov [#allocation2]   ;;  %s169_s13 = scalar_lea.hbm %s306_s0, 256 }
   0x3   :  { %s15_s10 = sshll.u32 %s241_s9, 4  ;;  %p170_p0 = scmp.ne.s32.totalorder %s306_s0, %s169_s13  ;;  %s16_s10 = int_to_ptr.vmem [resolvable:$true] %s15_s10 }
   0x4   :  { %p173_p1 = scmp.lt.u32.totalorder %s169_s13, %s306_s0 }
   0x6   :  { %p175_p2 = pnand %p173_p1, %p170_p0 }
   0x8   :  { %178 = shalt.err (!%p175_p2)
}
   0x9   :  { %s179_s18 = scalar_lea.vmem %s16_s10, 256  ;;  %p184_p4 = scmp.lt.s32.totalorder %s16_s10, %s16_s10 }
   0xa   :  { %p180_p3 = scmp.ne.s32.totalorder %s16_s10, %s179_s18  ;;  %p185_p5 = scmp.lt.s32.totalorder %s179_s18, %s179_s18 }
   0xc   :  { %p186_p6 = por %p185_p5, %p184_p4 }
   0xe   :  { %p187_p7 = pnand %p186_p6, %p180_p3 }
  0x10   :  { %190 = shalt.err (!%p187_p7)
}
  0x11   :  { %s242_s19 = smov 128   ;;  %s243_s20 = smov 8  }
  0x12   :  { %21 = dma.hbm_to_vmem [thread:$0]  %s306_s0, 256, %s16_s10, [#allocation3], %s242_s19, %s242_s19, %s243_s20  }
  0x13   :  { %s244_s23 = smov [#allocation5]   ;;  %s191_s27 = scalar_lea.hbm %s307_s1, 256 }
  0x14   :  { %s27_s24 = sshll.u32 %s244_s23, 4  ;;  %p192_p8 = scmp.ne.s32.totalorder %s307_s1, %s191_s27  ;;  %s28_s24 = int_to_ptr.vmem [resolvable:$true] %s27_s24 }
  0x15   :  { %p195_p9 = scmp.lt.u32.totalorder %s191_s27, %s307_s1 }
  0x17   :  { %p197_p10 = pnand %p195_p9, %p192_p8 }
  0x19   :  { %200 = shalt.err (!%p197_p10)
}
  0x1a   :  { %s201_s4 = scalar_lea.vmem %s28_s24, 256  ;;  %p206_p12 = scmp.lt.s32.totalorder %s28_s24, %s28_s24 }
  0x1b   :  { %p202_p11 = scmp.ne.s32.totalorder %s28_s24, %s201_s4  ;;  %p207_p13 = scmp.lt.s32.totalorder %s201_s4, %s201_s4 }
  0x1d   :  { %p208_p0 = por %p207_p13, %p206_p12 }
  0x1f   :  { %p209_p1 = pnand %p208_p0, %p202_p11 }
  0x21   :  { %212 = shalt.err (!%p209_p1)
}
  0x22   :  { %33 = dma.hbm_to_vmem [thread:$0]  %s307_s1, 256, %s28_s24, [#allocation6], %s242_s19, %s242_s19, %s243_s20  }
  0x23   :  { %235 = dma.done.wait [#allocation3], 256  }
  0x24   :  { %236 = vsyncadd [#allocation3], 4294967040 }
  0x25   :  { %237 = dma.done.wait [#allocation6], 256  }
  0x26   :  { %238 = vsyncadd [#allocation6], 4294967040  ;;  %vm44_vm0 = vcmask 130048   ;;  %v42_v0 = vld [vmem:[#allocation5] sm:$0xff]  ;;  %v43_v1 = vld [vmem:[#allocation5 + $0x8] sm:$0xff]  ;;  %s245_s6 = smov [#allocation7]  }
  0x27   :  { %v40_v2 = vld [vmem:[#allocation2] sm:$0xff]  ;;  %v160_v3 = vpack.c.bf16 %v43_v1, %v42_v0  ;;  %v41_v4 = vld [vmem:[#allocation2 + $0x8] sm:$0xff]  ;;  %s134_s7 = sshll.u32 %s245_s6, 4  ;;  %vm126_vm1 = vcmask 523264   ;;  %s135_s7 = int_to_ptr.vmem [resolvable:$true] %s134_s7 }
  0x28   :  { %157 = vmatprep.mubr.msk.f32.mxu0 %vm44_vm0, %v40_v2  ;;  %s213_s1 = scalar_lea.vmem %s135_s7, 256  ;;  %p218_p3 = scmp.lt.s32.totalorder %s135_s7, %s135_s7 }
  0x29   :  { %161 = vmatprep.subr.bf16.mxu0 %v160_v3  ;;  %p214_p2 = scmp.ne.s32.totalorder %s135_s7, %s213_s1  ;;  %p219_p4 = scmp.lt.s32.totalorder %s213_s1, %s213_s1 }
  0x2a   :  { %163 = vmatpush3.bf16.msra.mxu0 %v160_v3 }
  0x2b   :  { %p220_p5 = por %p219_p4, %p218_p3 }
  0x2d   :  { %158 = vmatmul.mubr.msk.f32.vlgmr.msra.gmra.mrb[0].mxu0 %vm44_vm0, %v41_v4  ;;  %p221_p6 = pnand %p220_p5, %p214_p2 }
 0x100   :  { %v159_v5 = vpop.f32.mrb[0].mxu0 }
 0x101   :  { %128 = vst.msk [vmem:[#allocation7 + $0x8] sm:$0xff] %vm126_vm1, %v159_v5  ;;  %v117_v6 = vpop.f32.mrb[1].mxu0 }
 0x102   :  { %127 = vst.msk [vmem:[#allocation7] sm:$0xff] %vm126_vm1, %v117_v6 }
 0x103   :  { %224 = shalt.err (!%p221_p6)
}
 0x104   :  { %s225_s10 = scalar_lea.hbm %s308_s2, 256 }
 0x105   :  { %p226_p7 = scmp.ne.s32.totalorder %s308_s2, %s225_s10  ;;  %p229_p8 = scmp.lt.u32.totalorder %s225_s10, %s308_s2 }
 0x107   :  { %p231_p9 = pnand %p229_p8, %p226_p7 }
 0x109   :  { %234 = shalt.err (!%p231_p9)
}
 0x10a   :  { %140 = dma.vmem_to_hbm [thread:$0]  %s135_s7, 256, %s308_s2, [#allocation4], %s242_s19, %s242_s19, %s243_s20  }
 0x10b   :  { %239 = dma.done.wait [#allocation4], 256  }
 0x10c   :  { %240 = vsyncadd [#allocation4], 4294967040 }
 0x10d   :  { %144 = vsyncpa [#allocation3], 1 }
 0x10e   :  { %145 = vsyncpa [#allocation6], 1 }
 0x10f   :  { %146 = vsyncpa [#allocation4], 1 }

</bundles_post_ra>
